<compile_context>
chip_gen: v7x
topology: tpu7x:2x2x1
jax: 0.10.0
libtpu: 0.0.40
codegen_flags: <defaults>
</compile_context>

<pallas_src>
import functools
import math

import jax
import jax.numpy as jnp
from jax.experimental import pallas as pl
from jax.experimental.pallas import tpu as pltpu


def _mean_pool_single_kernel(x_ref, o_ref, *, inv_n):
    # Whole node axis in one block: (TB, N, D) -> (TB, D), no scratch needed.
    partial = jnp.sum(x_ref[...], axis=1)
    o_ref[...] = (partial.astype(jnp.float32) * inv_n).astype(o_ref.dtype)


def _mean_pool_multi_kernel(x_ref, o_ref, acc_ref, *, inv_n):
    # x_ref:   (TB, TN, D) input tile  (D on lanes, TN on sublanes)
    # o_ref:   (TB, D)     output tile, resident across the reduction axis
    # acc_ref: (TB, D)     f32 VMEM accumulator
    k = pl.program_id(1)

    @pl.when(k == 0)
    def _init():
        acc_ref[...] = jnp.zeros_like(acc_ref)

    # Partial sum over this TN sub-tile of nodes. Sum in the input dtype and
    # upcast only the (TB, D) partial -> avoids materializing an f32 copy of
    # the whole (TB, TN, D) tile; cross-step accumulation is still f32.
    partial = jnp.sum(x_ref[...], axis=1)
    acc_ref[...] += partial.astype(jnp.float32)

    @pl.when(k == pl.num_programs(1) - 1)
    def _finalize():
        o_ref[...] = (acc_ref[...] * inv_n).astype(o_ref.dtype)


def _round_up(x, m):
    return (x + m - 1) // m * m


def mean_pooling(nodes: jax.Array, *, tb: int | None = None, tn: int | None = None) -> jax.Array:
    """Mean over axis -2, same semantics as torch.mean(nodes, dim=-2).

    nodes: (..., N, D) -> (..., D)
    """
    *lead, N, D = nodes.shape
    B = math.prod(lead) if lead else 1
    x = nodes.reshape(B, N, D)
    out_dtype = nodes.dtype
    itemsize = jnp.dtype(out_dtype).itemsize

    # ---- batch tile: sublane-aligned output stores; keep >= 2 parallel steps.
    if tb is None:
        if B <= 8:
            tb = B  # single block == full dim (no sublane-divisibility issue)
        else:
            tb = 8
            # Grow TB (up to 64) only when it divides B evenly and still leaves
            # >= 2 parallel grid steps (v7x dual TensorCore).
            while tb * 2 <= 64 and B % (tb * 2) == 0 and B // (tb * 2) >= 2:
                tb *= 2
    Bp = B if tb == B else _round_up(B, tb)

    # ---- node tile: bound the double-buffered input block (2 * TB*TN*D*itemsize)
    # well under every generation's default scoped VMEM (v5e 16 MiB, v6e/v7x 32
    # MiB scoped default) while keeping per-step DMA in the MiB range so the
    # ~0.35 us/step grid overhead is amortized.
    if tn is None:
        max_block_bytes = 4 * 1024 * 1024  # x2 for double-buffering = 8 MiB of input
        tn_cap = max(8, (max_block_bytes // (tb * D * itemsize)) // 8 * 8)
        tn = N if N <= tn_cap else tn_cap
    Np = N if tn == N else _round_up(N, tn)

    # Zero-pad ragged edges; zeros do not change the sum and we divide by the
    # true N. Padded batch rows are sliced off after the call.
    if (Bp, Np) != (B, N):
        x = jnp.pad(x, ((0, Bp - B), (0, Np - N), (0, 0)))

    inv_n = 1.0 / N
    n_blocks = Np // tn

    if n_blocks == 1:
        # Fast path: single pass over the node axis, no accumulator scratch.
        out = pl.pallas_call(
            functools.partial(_mean_pool_single_kernel, inv_n=inv_n),
            out_shape=jax.ShapeDtypeStruct((Bp, D), out_dtype),
            grid_spec=pltpu.PrefetchScalarGridSpec(
                num_scalar_prefetch=0,
                grid=(Bp // tb,),
                in_specs=[pl.BlockSpec((tb, Np, D), lambda b: (b, 0, 0))],
                out_specs=pl.BlockSpec((tb, D), lambda b: (b, 0)),
            ),
            compiler_params=pltpu.CompilerParams(
                dimension_semantics=("parallel",),
            ),
        )(x)
    else:
        out = pl.pallas_call(
            functools.partial(_mean_pool_multi_kernel, inv_n=inv_n),
            out_shape=jax.ShapeDtypeStruct((Bp, D), out_dtype),
            grid_spec=pltpu.PrefetchScalarGridSpec(
                num_scalar_prefetch=0,
                grid=(Bp // tb, n_blocks),
                in_specs=[pl.BlockSpec((tb, tn, D), lambda b, k: (b, k, 0))],
                out_specs=pl.BlockSpec((tb, D), lambda b, k: (b, 0)),
                scratch_shapes=[pltpu.VMEM((tb, D), jnp.float32)],
            ),
            compiler_params=pltpu.CompilerParams(
                dimension_semantics=("parallel", "arbitrary"),
            ),
        )(x)

    return out[:B].reshape(*lead, D)


if __name__ == "__main__":
    key = jax.random.PRNGKey(0)

    # (shape, tile overrides) -- small cases exercising every code path:
    #   fast single-block path, multi-step N reduction, padded N, padded B,
    #   tiny non-128 D (full-dim blocks), extra leading dims.
    cases = [
        ((16, 64, 128), {}),                    # fast path, TB=8 -> 2 parallel steps
        ((16, 64, 128), {"tb": 8, "tn": 16}),   # 4-step reduction via accumulator
        ((16, 64, 128), {"tb": 8, "tn": 24}),   # N padded 64 -> 72 (zeros)
        ((12, 64, 128), {}),                    # B padded 12 -> 16, output sliced
        ((2, 8, 32), {}),                       # tiny, D not a multiple of 128
        ((2, 3, 40, 128), {}),                  # extra leading dims, ragged N
        ((2, 3, 40, 128), {"tn": 16}),          # leading dims + multi-step + padded N
    ]

    for i, (shape, kwargs) in enumerate(cases):
        k = jax.random.fold_in(key, i)
        nodes = jax.random.normal(k, shape, dtype=jnp.float32)

        out = jax.block_until_ready(mean_pooling(nodes, **kwargs))
        ref = jnp.mean(nodes, axis=-2)

        assert out.shape == ref.shape, (shape, out.shape, ref.shape)
        assert jnp.allclose(out, ref, atol=1e-5, rtol=1e-5), (shape, kwargs)

    print("KERNEL_OK")
</pallas_src>

<mosaic_0001>
module attributes {stable_mosaic.version = 11 : i64} {
  func.func @_mean_pool_single_kernel(%arg0: i32, %arg1: memref<8x64x128xf32, #tpu.memory_space<vmem>>, %arg2: memref<8x128xf32, #tpu.memory_space<vmem>>) attributes {dimension_semantics = [#tpu.dimension_semantics<parallel>], iteration_bounds = array<i64: 2>, scalar_prefetch = 0 : i64, scratch_operands = 0 : i64, tpu.core_type = #tpu.core_type<tc>, window_params = [{transform_indices = @transform_0, window_bounds = array<i64: 8, 64, 128>}, {transform_indices = @transform_1, window_bounds = array<i64: 8, 128>}]} {
    %c0 = arith.constant 0 : index
    %c0_0 = arith.constant 0 : index
    %c0_1 = arith.constant 0 : index
    %0 = vector.load %arg1[%c0, %c0_0, %c0_1] : memref<8x64x128xf32, #tpu.memory_space<vmem>>, vector<8x64x128xf32>
    %cst = arith.constant dense<0.000000e+00> : vector<8x128xf32>
    %1 = vector.multi_reduction <add>, %0, %cst [1] : vector<8x64x128xf32> to vector<8x128xf32>
    %cst_2 = arith.constant 1.562500e-02 : f32
    %2 = vector.broadcast %cst_2 : f32 to vector<8x128xf32>
    %3 = arith.mulf %1, %2 : vector<8x128xf32>
    %c0_3 = arith.constant 0 : index
    %c0_4 = arith.constant 0 : index
    %4 = vector.load %arg2[%c0_3, %c0_4] : memref<8x128xf32, #tpu.memory_space<vmem>>, vector<8x128xf32>
    tpu.vector_store %arg2[%c0_3, %c0_4], %3 {strides = array<i32>} : memref<8x128xf32, #tpu.memory_space<vmem>>, vector<8x128xf32>,
    return
  }
  func.func @transform_0(%arg0: i32) -> (i32, i32, i32) {
    %c0_i32 = arith.constant 0 : i32
    %c0_i32_0 = arith.constant 0 : i32
    %c0_i32_1 = arith.constant 0 : i32
    return %arg0, %c0_i32, %c0_i32_0 : i32, i32, i32
  }
  func.func @transform_1(%arg0: i32) -> (i32, i32) {
    %c0_i32 = arith.constant 0 : i32
    %c0_i32_0 = arith.constant 0 : i32
    return %arg0, %c0_i32 : i32, i32
  }
}

</mosaic_0001>

<bundles_post_ra>
// kernel: tpu_custom_call.1
= control target key start
LH: loop header
LB: loop body
LE: loop exit
PB: predicated region body
PF: predicated region fallthrough
CT: control target
= control target key end

     0   :  { %6 = vsyncpa [#allocation3], 0  ;;  %s824_s0 = inlined_call_operand.hbm [shape: f32[16,64,128], index: 0, kind: input, shape index: {}]   ;;  %s825_s1 = inlined_call_operand.hbm [shape: f32[16,128], index: 1, kind: output, shape index: {}]  }
   0x1   :  { %8 = vsyncpa [#allocation3 + $0x1], 0 }
   0x2   :  { %9 = vsyncpa [#allocation4], 0 }
   0x3   :  { %11 = vsyncpa [#allocation4 + $0x1], 0  ;;  %s597_s6 = smov 0   ;;  %s599_s7 = smov 0  }
   0x4   :  { %s601_s8 = smov 0   ;;  %s603_s9 = smov 0  }
   0x5 LB: > { %s618_s10 = sadd.s32 4294967295, %s581_s9   ;;  %s421_s11 = sadd.s32 4294967294, %s581_s9   ;;  %s581_s9 = sphi %s603_s9, %s838_s9   ;;  %s577_s8 = sphi %s601_s8, %s837_s8   ;;  %s573_s7 = sphi %s599_s7, %s836_s7   ;;  %s569_s6 = sphi %s597_s6, %s835_s6  }
   0x6   : > { %s622_s12 = sadd.s32 1, %s581_s9   ;;  %s24_s13 = sadd.s32 1, %s577_s8 }
   0x7   : > { %s21_s14 = ssub.s32 %s581_s9, %s622_s12  ;;  %p31_p0 = scmp.ne.s32.totalorder %s577_s8, %s573_s7 }
   0x8   : > { %p22_p1 = scmp.eq.s32.totalorder %s21_s14, 0  ;;  %p32_p2 = scmp.eq.s32.totalorder %s581_s9, 0 }
   0x9   : > { %p37_p3 = scmp.ne.s32.totalorder %s573_s7, %s569_s6  ;;  %p38_p4 = scmp.eq.s32.totalorder %s618_s10, 0 }
   0xa   : > { %s634_s15 = scalar_select %p22_p1, %s577_s8, %s24_s13  }
   0xb   : > { %p636_p5 = por %p32_p2, %p31_p0  ;;  %p640_p6 = por %p38_p4, %p37_p3 }
   0xc   : > { %p61_p7 = scmp.eq.s32.totalorder %s618_s10, 1  ;;  %p67_p8 = scmp.eq.s32.totalorder %s421_s11, 1 }
   0xd   : > { %p449_p10 = scmp.lt.s32.totalorder %s581_s9, 2  ;;  %s87_s20 = sand.u32 1, %s577_s8  }
   0xe   : > { %p647_p11 = por %p61_p7, %p31_p0  ;;  %p651_p12 = por %p67_p8, %p37_p3 }
   0xf   : > { %s436_s21 = sshll.u32 %s581_s9, 13  ;;  %s424_s22 = sshll.u32 %s87_s20, 9 }
  0x10   : > { %s829_s18 = scalar_select %p647_p11, 1, 0 }
  0x11   : > { %s830_s19 = scalar_select %p651_p12, 1, 0 }
  0x12   : > { %s660_s25 = scalar_lea.hbm %s824_s0, %s436_s21  ;;  %s91_s26 = scalar_lea.vmem [#allocation2], %s424_s22 }
  0x13   : > { %s99_s27 = sshll.u32 %s91_s26, 4  ;;  %p664_p13 = pnand %p449_p10, %p636_p5  ;;  %s668_s27 = int_to_ptr.vmem [resolvable:$true] %s99_s27 }
  0x14   : > { %s670_s29 = scalar_lea.sflag [#allocation3], %s87_s20  ;;  %s485_s30 = scalar_lea.hbm %s660_s25, 8192 }
  0x15   : > { %p486_p0 = scmp.ne.s32.totalorder %s660_s25, %s485_s30  ;;  %p487_p1 = pneg %p664_p13 }
  0x16   : > { %s490_s4 = scalar_lea.hbm %s824_s0, 16384  ;;  %p491_p4 = scmp.lt.u32.totalorder %s660_s25, %s824_s0 }
  0x17   : > { %p488_p2 = pnand %p487_p1, %p486_p0  ;;  %p492_p5 = scmp.lt.u32.totalorder %s490_s4, %s485_s30 }
  0x18   : > { %p494_p8 = scmp.lt.u32.totalorder %s485_s30, %s660_s25 }
  0x19   : > { %p489_p3 = pneg %p488_p2  ;;  %p493_p7 = por %p492_p5, %p491_p4 }
  0x1b   : > { %p495_p10 = por %p494_p8, %p493_p7 }
  0x1d   : > { %p496_p9 = pnand %p495_p10, %p489_p3 }
  0x1f   : > { %499 = shalt.err (!%p496_p9)
}
  0x20   : > { %s500_s13 = scalar_lea.vmem %s668_s27, 8192  ;;  %s583_s14 = smov [#allocation2]  }
  0x21   : > { %p501_p0 = scmp.ne.s32.totalorder %s668_s27, %s500_s13  ;;  %s505_s16 = sshll.u32 %s583_s14, 4  ;;  %s506_s16 = int_to_ptr.vmem [resolvable:$false] %s505_s16 }
  0x22   : > { %s507_s20 = scalar_lea.vmem %s506_s16, 16384  ;;  %p508_p11 = scmp.lt.s32.totalorder %s668_s27, %s506_s16 }
  0x23   : > { %p503_p2 = pnand %p501_p0, %p487_p1  ;;  %p509_p4 = scmp.lt.s32.totalorder %s507_s20, %s500_s13 }
  0x25   : > { %p504_p12 = pneg %p503_p2  ;;  %p510_p5 = por %p509_p4, %p508_p11 }
  0x27   : > { %p511_p7 = pnand %p510_p5, %p504_p12 }
  0x29   : > { %514 = shalt.err (!%p511_p7)
}
  0x2a   : > { %s584_s21 = smov 128   ;;  %s585_s22 = smov 8  }
  0x2b   : > { %444 = dma.hbm_to_vmem [thread:$0]  (!%p664_p13), %s660_s25, 8192, %s668_s27, %s670_s29, %s584_s21, %s584_s21, %s585_s22  }
  0x2c   : > { %p428_p9 = scmp.ge.s32.totalorder %s581_s9, 1  ;;  %p107_p1 = scmp.lt.s32.totalorder %s581_s9, 3 }
  0x2e   : > { %p108_p3 = pnand %p428_p9, %p107_p1 }
  0x2f   : > { %s701_s23 = sand.u32 (!%p108_p3), 1, %s573_s7  }
  0x30   : > { %111 = sbr.rel (%p108_p3) target bundleno = 117 (0x75), region = 24  ;;  %s429_s24 = sshll.u32 (!%p108_p3), %s701_s23, 9 }
  0x31   : > { %s114_s26 = scalar_lea.sflag (!%p108_p3), [#allocation3], %s701_s23  ;;  %s705_s30 = scalar_lea.vmem (!%p108_p3), [#allocation2], %s429_s24 }
  0x37   : > { %560 = dma.done.wait (%p640_p6), %s114_s26, 8192  }
  0x38   : > { %562 = vsyncadd (%p640_p6), %s114_s26, 4294959104  ;;  %v137_v0 = vld [vmem:[%s705_s30] sm:$0xff]  ;;  %v138_v1 = vld [vmem:[%s705_s30 + $0x8] sm:$0xff]  ;;  %vm321_vm0 = vcmask 1041409   ;;  %vm323_vm1 = vcmask 1042434   ;;  %vm325_vm2 = vcmask 1043459  }
  0x39   : > { %v139_v2 = vld [vmem:[%s705_s30 + $0x10] sm:$0xff]  ;;  %v201_v3 = vadd.f32 %v138_v1, %v137_v0  ;;  %v140_v4 = vld [vmem:[%s705_s30 + $0x18] sm:$0xff]  ;;  %v145_v5 = vld [vmem:[%s705_s30 + $0x40] sm:$0xff]  ;;  %vm327_vm3 = vcmask 1044484   ;;  %s430_s17 = sshll.u32 %s701_s23, 3  ;;  %vm329_vm4 = vcmask 1045509  }
  0x3a   : > { %v146_v6 = vld [vmem:[%s705_s30 + $0x48] sm:$0xff]  ;;  %v147_v7 = vld [vmem:[%s705_s30 + $0x50] sm:$0xff]  ;;  %v141_v9 = vld [vmem:[%s705_s30 + $0x20] sm:$0xff]  ;;  %vm331_vm5 = vcmask 1046534   ;;  %s432_s25 = sshll.u32 %s618_s10, 7  ;;  %s135_s27 = scalar_lea.vmem [#allocation5], %s430_s17 }
  0x3b   : > { %v202_v8 = vadd.f32 %v201_v3, %v139_v2  ;;  %v214_v10 = vadd.f32 %v146_v6, %v145_v5  ;;  %v148_v11 = vld [vmem:[%s705_s30 + $0x58] sm:$0xff]  ;;  %v153_v12 = vld [vmem:[%s705_s30 + $0x80] sm:$0xff]  ;;  %v154_v13 = vld [vmem:[%s705_s30 + $0x88] sm:$0xff]  ;;  %s351_s28 = sshll.u32 %s135_s27, 4  ;;  %vm333_vm6 = vcmask 1047559   ;;  %s780_s3 = scalar_lea.hbm %s825_s1, %s432_s25  ;;  %s782_s28 = int_to_ptr.vmem [resolvable:$true] %s351_s28 }
  0x3c   : > { %v142_v15 = vld [vmem:[%s705_s30 + $0x28] sm:$0xff]  ;;  %v155_v16 = vld [vmem:[%s705_s30 + $0x90] sm:$0xff]  ;;  %v227_v18 = vadd.f32 %v154_v13, %v153_v12  ;;  %v149_v20 = vld [vmem:[%s705_s30 + $0x60] sm:$0xff]  ;;  %s338_s4 = scalar_lea.sflag [#allocation4], %s701_s23  ;;  %s515_s5 = scalar_lea.vmem %s782_s28, 128 }
  0x3d   : > { %v203_v14 = vadd.f32 %v202_v8, %v140_v4  ;;  %v215_v17 = vadd.f32 %v214_v10, %v147_v7  ;;  %v143_v19 = vld [vmem:[%s705_s30 + $0x30] sm:$0xff]  ;;  %v156_v21 = vld [vmem:[%s705_s30 + $0x98] sm:$0xff]  ;;  %v161_v23 = vld [vmem:[%s705_s30 + $0xc0] sm:$0xff]  ;;  %p516_p6 = scmp.ne.s32.totalorder %s782_s28, %s515_s5  ;;  %p832_p11 = scmp.ne.s32.totalorder %s829_s18, 0 }
  0x3e   : > { %v162_v24 = vld [vmem:[%s705_s30 + $0xc8] sm:$0xff]  ;;  %v163_v25 = vld [vmem:[%s705_s30 + $0xd0] sm:$0xff]  ;;  %v228_v27 = vadd.f32 %v227_v18, %v155_v16  ;;  %v144_v28 = vld [vmem:[%s705_s30 + $0x38] sm:$0xff]  ;;  %s586_s10 = smov [#allocation5]  }
  0x3f   : > { %v204_v22 = vadd.f32 %v203_v14, %v141_v9  ;;  %v216_v26 = vadd.f32 %v215_v17, %v148_v11  ;;  %v150_v29 = vld [vmem:[%s705_s30 + $0x68] sm:$0xff]  ;;  %v157_v30 = vld [vmem:[%s705_s30 + $0xa0] sm:$0xff]  ;;  %v240_v32 = vadd.f32 %v162_v24, %v161_v23  ;;  %v151_v33 = vld [vmem:[%s705_s30 + $0x70] sm:$0xff]  ;;  %p517_p12 = pnand %p516_p6, %p832_p11  ;;  %s519_s11 = sshll.u32 %s586_s10, 4  ;;  %s520_s11 = int_to_ptr.vmem [resolvable:$false] %s519_s11 }
  0x40   : > { %v164_v34 = vld [vmem:[%s705_s30 + $0xd8] sm:$0xff]  ;;  %v169_v35 = vld [vmem:[%s705_s30 + $0x100] sm:$0xff]  ;;  %v229_v37 = vadd.f32 %v228_v27, %v156_v21  ;;  %v158_v38 = vld [vmem:[%s705_s30 + $0xa8] sm:$0xff]  ;;  %s521_s13 = scalar_lea.vmem %s520_s11, 256  ;;  %p522_p8 = scmp.lt.s32.totalorder %s782_s28, %s520_s11 }
  0x41   : > { %v205_v31 = vadd.f32 %v204_v22, %v142_v15  ;;  %v217_v36 = vadd.f32 %v216_v26, %v149_v20  ;;  %v170_v39 = vld [vmem:[%s705_s30 + $0x108] sm:$0xff]  ;;  %v171_v40 = vld [vmem:[%s705_s30 + $0x110] sm:$0xff]  ;;  %v241_v42 = vadd.f32 %v240_v32, %v163_v25  ;;  %v152_v43 = vld [vmem:[%s705_s30 + $0x78] sm:$0xff]  ;;  %p518_p13 = pneg %p517_p12  ;;  %p523_p10 = scmp.lt.s32.totalorder %s521_s13, %s515_s5 }
  0x42   : > { %v159_v44 = vld [vmem:[%s705_s30 + $0xb0] sm:$0xff]  ;;  %v165_v45 = vld [vmem:[%s705_s30 + $0xe0] sm:$0xff]  ;;  %v230_v47 = vadd.f32 %v229_v37, %v157_v30  ;;  %v253_v48 = vadd.f32 %v170_v39, %v169_v35  ;;  %v172_v49 = vld [vmem:[%s705_s30 + $0x118] sm:$0xff] }
  0x43   : > { %v206_v41 = vadd.f32 %v205_v31, %v143_v19  ;;  %v218_v46 = vadd.f32 %v217_v36, %v150_v29  ;;  %v177_v50 = vld [vmem:[%s705_s30 + $0x140] sm:$0xff]  ;;  %v178_v51 = vld [vmem:[%s705_s30 + $0x148] sm:$0xff]  ;;  %v242_v53 = vadd.f32 %v241_v42, %v164_v34  ;;  %v160_v54 = vld [vmem:[%s705_s30 + $0xb8] sm:$0xff]  ;;  %p524_p0 = por %p523_p10, %p522_p8 }
  0x44   : > { %v166_v55 = vld [vmem:[%s705_s30 + $0xe8] sm:$0xff]  ;;  %v179_v56 = vld [vmem:[%s705_s30 + $0x150] sm:$0xff]  ;;  %v231_v58 = vadd.f32 %v230_v47, %v158_v38  ;;  %v254_v59 = vadd.f32 %v253_v48, %v171_v40  ;;  %v266_v60 = vadd.f32 %v178_v51, %v177_v50  ;;  %v173_v62 = vld [vmem:[%s705_s30 + $0x120] sm:$0xff] }
  0x45   : > { %v207_v52 = vadd.f32 %v206_v41, %v144_v28  ;;  %v219_v57 = vadd.f32 %v218_v46, %v151_v33  ;;  %v167_v61 = vld [vmem:[%s705_s30 + $0xf0] sm:$0xff]  ;;  %v180_v63 = vld [vmem:[%s705_s30 + $0x158] sm:$0xff]  ;;  %v243_v1 = vadd.f32 %v242_v53, %v165_v45  ;;  %v185_v2 = vld [vmem:[%s705_s30 + $0x180] sm:$0xff]  ;;  %p525_p2 = pnand %p524_p0, %p518_p13 }
  0x46   : > { %v186_v3 = vld [vmem:[%s705_s30 + $0x188] sm:$0xff]  ;;  %v187_v4 = vld [vmem:[%s705_s30 + $0x190] sm:$0xff]  ;;  %v232_v6 = vadd.f32 %v231_v58, %v159_v44  ;;  %v255_v7 = vadd.f32 %v254_v59, %v172_v49  ;;  %v267_v8 = vadd.f32 %v266_v60, %v179_v56  ;;  %v181_v10 = vld [vmem:[%s705_s30 + $0x160] sm:$0xff] }
  0x47   : > { %v208_v0 = vrot.slane %v207_v52, 4  ;;  %v220_v5 = vadd.f32 %v219_v57, %v152_v43  ;;  %v174_v9 = vld [vmem:[%s705_s30 + $0x128] sm:$0xff]  ;;  %v244_v12 = vadd.f32 %v243_v1, %v166_v55  ;;  %v279_v13 = vadd.f32 %v186_v3, %v185_v2  ;;  %v168_v14 = vld [vmem:[%s705_s30 + $0xf8] sm:$0xff]  ;;  %v193_v16 = vld [vmem:[%s705_s30 + $0x1c0] sm:$0xff] }
  0x48   : > { %v188_v15 = vld [vmem:[%s705_s30 + $0x198] sm:$0xff]  ;;  %v233_v18 = vadd.f32 %v232_v6, %v160_v54  ;;  %v256_v19 = vadd.f32 %v255_v7, %v173_v62  ;;  %v268_v20 = vadd.f32 %v267_v8, %v180_v63  ;;  %v175_v21 = vld [vmem:[%s705_s30 + $0x130] sm:$0xff]  ;;  %v182_v22 = vld [vmem:[%s705_s30 + $0x168] sm:$0xff] }
  0x49   : > { %v209_v11 = vadd.f32 %v208_v0, %v207_v52  ;;  %v221_v17 = vrot.slane %v220_v5, 4  ;;  %v194_v23 = vld [vmem:[%s705_s30 + $0x1c8] sm:$0xff]  ;;  %v245_v25 = vadd.f32 %v244_v12, %v167_v61  ;;  %v280_v26 = vadd.f32 %v279_v13, %v187_v4  ;;  %v189_v27 = vld [vmem:[%s705_s30 + $0x1a0] sm:$0xff]  ;;  %v195_v28 = vld [vmem:[%s705_s30 + $0x1d0] sm:$0xff] }
  0x4a   : > { %v234_v30 = vrot.slane %v233_v18, 4  ;;  %v257_v31 = vadd.f32 %v256_v19, %v174_v9  ;;  %v269_v32 = vadd.f32 %v268_v20, %v181_v10  ;;  %v176_v33 = vld [vmem:[%s705_s30 + $0x138] sm:$0xff]  ;;  %v183_v34 = vld [vmem:[%s705_s30 + $0x170] sm:$0xff]  ;;  %v292_v38 = vadd.f32 %v194_v23, %v193_v16  ;;  %v190_v39 = vld [vmem:[%s705_s30 + $0x1a8] sm:$0xff] }
  0x4b   : > { %v210_v24 = vrot.slane %v209_v11, 2  ;;  %v222_v29 = vadd.f32 %v221_v17, %v220_v5  ;;  %v246_v36 = vadd.f32 %v245_v25, %v168_v14  ;;  %v281_v37 = vadd.f32 %v280_v26, %v188_v15  ;;  %v196_v40 = vld [vmem:[%s705_s30 + $0x1d8] sm:$0xff]  ;;  %v191_v50 = vld [vmem:[%s705_s30 + $0x1b0] sm:$0xff]  ;;  %v197_v51 = vld [vmem:[%s705_s30 + $0x1e0] sm:$0xff] }
  0x4c   : > { %v235_v42 = vadd.f32 %v234_v30, %v233_v18  ;;  %v258_v43 = vadd.f32 %v257_v31, %v175_v21  ;;  %v270_v44 = vadd.f32 %v269_v32, %v182_v22  ;;  %v184_v45 = vld [vmem:[%s705_s30 + $0x178] sm:$0xff]  ;;  %v293_v49 = vadd.f32 %v292_v38, %v195_v28  ;;  %v198_v61 = vld [vmem:[%s705_s30 + $0x1e8] sm:$0xff]  ;;  %v199_v6 = vld [vmem:[%s705_s30 + $0x1f0] sm:$0xff] }
  0x4d   : > { %v211_v35 = vadd.f32 %v210_v24, %v209_v11  ;;  %v223_v41 = vrot.slane %v222_v29, 2  ;;  %v247_v47 = vrot.slane %v246_v36, 4  ;;  %v282_v48 = vadd.f32 %v281_v37, %v189_v27  ;;  %v192_v60 = vld [vmem:[%s705_s30 + $0x1b8] sm:$0xff] }
  0x4e   : > { %v236_v53 = vrot.slane %v235_v42, 2  ;;  %v259_v54 = vadd.f32 %v258_v43, %v176_v33  ;;  %v271_v55 = vadd.f32 %v270_v44, %v183_v34  ;;  %v294_v59 = vadd.f32 %v293_v49, %v196_v40  ;;  %v200_v14 = vld [vmem:[%s705_s30 + $0x1f8] sm:$0xff] }
  0x4f   : > { %v212_v46 = vrot.slane %v211_v35, 1  ;;  %v224_v52 = vadd.f32 %v223_v41, %v222_v29  ;;  %v248_v57 = vadd.f32 %v247_v47, %v246_v36  ;;  %v283_v58 = vadd.f32 %v282_v48, %v190_v39 }
  0x50   : > { %v237_v63 = vadd.f32 %v236_v53, %v235_v42  ;;  %v260_v0 = vrot.slane %v259_v54, 4  ;;  %v272_v1 = vadd.f32 %v271_v55, %v184_v45  ;;  %v295_v4 = vadd.f32 %v294_v59, %v197_v51 }
  0x51   : > { %v213_v56 = vadd.f32 %v212_v46, %v211_v35  ;;  %v225_v62 = vrot.slane %v224_v52, 1  ;;  %v249_v2 = vrot.slane %v248_v57, 2  ;;  %v284_v3 = vadd.f32 %v283_v58, %v191_v50 }
  0x52   : > { %v238_v8 = vrot.slane %v237_v63, 1  ;;  %v261_v9 = vadd.f32 %v260_v0, %v259_v54  ;;  %v273_v10 = vrot.slane %v272_v1, 4  ;;  %v296_v13 = vadd.f32 %v295_v4, %v198_v61 }
  0x53   : > { %v305_v5 = vmul.f32 0.015625, %v213_v56  ;;  %v226_v7 = vadd.f32 %v225_v62, %v224_v52  ;;  %v250_v11 = vadd.f32 %v249_v2, %v248_v57  ;;  %v285_v12 = vadd.f32 %v284_v3, %v192_v60 }
  0x54   : > { %v239_v15 = vadd.f32 %v238_v8, %v237_v63  ;;  %v262_v16 = vrot.slane %v261_v9, 2  ;;  %v274_v17 = vadd.f32 %v273_v10, %v272_v1  ;;  %v297_v21 = vadd.f32 %v296_v13, %v199_v6 }
  0x55   : > { %v306_v18 = vmul.f32 0.015625, %v226_v7  ;;  %v251_v19 = vrot.slane %v250_v11, 1  ;;  %v286_v20 = vrot.slane %v285_v12, 4 }
  0x56   : > { %v263_v22 = vadd.f32 %v262_v16, %v261_v9  ;;  %v275_v23 = vrot.slane %v274_v17, 2  ;;  %v307_v24 = vmul.f32 0.015625, %v239_v15  ;;  %v298_v28 = vadd.f32 %v297_v21, %v200_v14 }
  0x57   : > { %v322_v25 = vsel %vm321_vm0, %v306_v18, %v305_v5  ;;  %v252_v26 = vadd.f32 %v251_v19, %v250_v11  ;;  %v287_v27 = vadd.f32 %v286_v20, %v285_v12 }
  0x58   : > { %v264_v29 = vrot.slane %v263_v22, 1  ;;  %v276_v30 = vadd.f32 %v275_v23, %v274_v17  ;;  %v324_v31 = vsel %vm323_vm1, %v307_v24, %v322_v25  ;;  %v299_v33 = vrot.slane %v298_v28, 4 }
  0x59   : > { %v288_v32 = vrot.slane %v287_v27, 2  ;;  %v308_v34 = vmul.f32 0.015625, %v252_v26 }
  0x5a   : > { %v265_v35 = vadd.f32 %v264_v29, %v263_v22  ;;  %v277_v36 = vrot.slane %v276_v30, 1  ;;  %v300_v38 = vadd.f32 %v299_v33, %v298_v28 }
  0x5b   : > { %v289_v37 = vadd.f32 %v288_v32, %v287_v27  ;;  %v326_v39 = vsel %vm325_vm2, %v308_v34, %v324_v31 }
  0x5c   : > { %v278_v40 = vadd.f32 %v277_v36, %v276_v30  ;;  %v309_v41 = vmul.f32 0.015625, %v265_v35  ;;  %v301_v43 = vrot.slane %v300_v38, 2 }
  0x5d   : > { %v290_v42 = vrot.slane %v289_v37, 1 }
  0x5e   : > { %v310_v44 = vmul.f32 0.015625, %v278_v40  ;;  %v328_v45 = vsel %vm327_vm3, %v309_v41, %v326_v39  ;;  %v302_v47 = vadd.f32 %v301_v43, %v300_v38 }
  0x5f   : > { %v291_v46 = vadd.f32 %v290_v42, %v289_v37 }
  0x60   : > { %v303_v48 = vrot.slane %v302_v47, 1  ;;  %v330_v50 = vsel %vm329_vm4, %v310_v44, %v328_v45 }
  0x61   : > { %v311_v49 = vmul.f32 0.015625, %v291_v46 }
  0x62   : > { %v304_v51 = vadd.f32 %v303_v48, %v302_v47 }
  0x63   : > { %v332_v52 = vsel %vm331_vm5, %v311_v49, %v330_v50 }
  0x64   : > { %v312_v53 = vmul.f32 0.015625, %v304_v51 }
  0x66   : > { %v334_v54 = vsel %vm333_vm6, %v312_v53, %v332_v52 }
  0x67   : > { %336 = vst [vmem:[%s135_s27] sm:$0xff] %v334_v54 }
  0x68   : > { %528 = shalt.err (!%p525_p2)
}
  0x69   : > { %s529_s14 = scalar_lea.hbm %s780_s3, 128  ;;  %s533_s21 = scalar_lea.hbm %s825_s1, 256 }
  0x6a   : > { %p530_p4 = scmp.ne.s32.totalorder %s780_s3, %s529_s14  ;;  %p534_p9 = scmp.lt.u32.totalorder %s780_s3, %s825_s1 }
  0x6b   : > { %p535_p1 = scmp.lt.u32.totalorder %s533_s21, %s529_s14  ;;  %p537_p6 = scmp.lt.u32.totalorder %s529_s14, %s780_s3 }
  0x6c   : > { %p531_p5 = pnand %p530_p4, %p832_p11 }
  0x6d   : > { %p536_p3 = por %p535_p1, %p534_p9 }
  0x6e   : > { %p532_p7 = pneg %p531_p5 }
  0x6f   : > { %p538_p12 = por %p537_p6, %p536_p3 }
  0x71   : > { %p539_p13 = pnand %p538_p12, %p532_p7 }
  0x73   : > { %542 = shalt.err (!%p539_p13)
}
  0x74   : > { %439 = dma.vmem_to_hbm [thread:$0]  (%p832_p11), %s782_s28, 128, %s780_s3, %s338_s4  }
  0x75 PF: > { %s363_s24 = sand.u32 1, %s569_s6   ;;  %p833_p8 = scmp.ne.s32.totalorder %s830_s19, 0 }
  0x76   : > { %p834_p10 = scmp.ge.s32.totalorder %s581_s9, 2  ;;  %s364_s26 = scalar_lea.sflag [#allocation4], %s363_s24 }
  0x78   : > { %p446_p0 = pnand %p834_p10, %p833_p8 }
  0x7a   : > { %564 = dma.done.wait (!%p446_p0), %s364_s26, 128  }
  0x7b   : > { %566 = vsyncadd (!%p446_p0), %s364_s26, 4294967168  ;;  %p14_p2 = scmp.ge.s32.totalorder %s622_s12, 4   ;;  %s835_s6 = smov %s573_s7 }
  0x7c   : > { %s836_s7 = smov %s577_s8  ;;  %s837_s8 = smov %s634_s15 }
  0x7d   : > { %s838_s9 = smov %s622_s12  ;;  %16 = sbr.rel (!%p14_p2) target bundleno = 5 (0x5), region = 69 }
  0x84   :  { %369 = vsyncpa [#allocation3], 1 }
  0x85   :  { %371 = vsyncpa [#allocation3 + $0x1], 1 }
  0x86   :  { %372 = vsyncpa [#allocation4], 1 }
  0x87   :  { %374 = vsyncpa [#allocation4 + $0x1], 1 }

</bundles_post_ra>
